<compile_context>
chip_gen: v6e
topology: v6e:2x2x1
jax: 0.10.0
libtpu: 0.0.40
codegen_flags: <defaults>
</compile_context>

<pallas_src>
import functools

import jax
import jax.numpy as jnp
from jax.experimental import pallas as pl
from jax.experimental.pallas import tpu as pltpu

BN_EPS = 1e-5
_LANE = 128


@functools.lru_cache(maxsize=1)
def _tile_width():
    """Preferred output-feature tile width for this TPU generation."""
    try:
        kind = jax.devices()[0].device_kind.lower()
    except Exception:
        return _LANE
    # v6e / v7x MXUs are 256 wide; older generations (v2-v5e) are 128 wide.
    if "v6" in kind or "v7" in kind or "tpu7" in kind:
        return 256
    return _LANE


def _bn_relu(h, gamma, beta):
    """Training-mode BatchNorm1d (biased var, one-pass stats) + ReLU."""
    inv_n = 1.0 / h.shape[0]
    mean = jnp.sum(h, axis=0, keepdims=True) * inv_n               # (1, t)
    ex2 = jnp.sum(h * h, axis=0, keepdims=True) * inv_n
    var = jnp.maximum(ex2 - mean * mean, 0.0)                      # guard cancellation
    a = gamma * jax.lax.rsqrt(var + BN_EPS)                        # fused scale
    c = beta - mean * a                                            # fused shift
    return jnp.maximum(h * a + c, 0.0)


def _interleave_schedule(n_bn, n_copy):
    """Grid-step schedule spreading BN (matmul) tiles evenly along the grid.

    Megacore sharding splits a "parallel" grid axis into contiguous halves,
    so interleaving keeps both v7x TensorCores busy with matmul work.
    Also returns, per grid step, the W/gamma/beta column-block to present
    (forward-filled to the next BN step) so copy steps never force an extra
    W column fetch.
    """
    n = n_bn + n_copy
    key = [(t + 0.5) / n_bn if t < n_bn else (t - n_bn + 0.5) / n_copy
           for t in range(n)]
    order = sorted(range(n), key=lambda t: key[t])
    wcol = [0] * n
    nxt = next(t for t in reversed(order) if t < n_bn)    # last BN column
    for j in reversed(range(n)):
        if order[j] < n_bn:
            nxt = order[j]
        wcol[j] = nxt
    return order, wcol


def _residual_kernel_tiled(perm_ref, wcol_ref, x_ref, w_ref, g_ref, be_ref,
                           out_ref, *, n_bn_tiles, n_copy_tiles, tile_f):
    """One tile_f-wide tile of the fused output [ReLU(BN(x @ W)) | x].

    perm_ref[j] < n_bn_tiles  -> Linear + BN + ReLU tile (column perm[j]).
    perm_ref[j] >= n_bn_tiles -> residual copy of a 128-aligned static slice
                                 of the resident matmul LHS (no extra HBM
                                 read of x, no second input stream).
    Every store is a full, unmasked (B, tile_f) write; BN stats are per
    feature so tiles are independent -> the grid axis is "parallel".
    """
    del wcol_ref  # consumed only by the index_maps
    t = perm_ref[pl.program_id(0)]

    @pl.when(t < n_bn_tiles)
    def _():
        # Linear bias omitted: exactly cancelled by the BN mean subtraction.
        h = jnp.dot(x_ref[...], w_ref[...], preferred_element_type=jnp.float32)
        out_ref[...] = _bn_relu(h, g_ref[...], be_ref[...]).astype(out_ref.dtype)

    # Residual copy tiles: static, 128-aligned slices of the resident LHS.
    for c in range(n_copy_tiles):
        @pl.when(t == n_bn_tiles + c)
        def _(c=c):
            out_ref[...] = x_ref[:, c * tile_f:(c + 1) * tile_f].astype(out_ref.dtype)


def _residual_kernel_fused_single(x_ref, w_ref, g_ref, be_ref, out_ref, *, o):
    """Single-block fallback for feature widths not aligned to 128 lanes.

    The wrapper augments W with an identity block and zero lane-padding, so
    h = x @ W_aug = [x @ W | x | 0] comes out of ONE MXU pass.  BN/ReLU is
    applied full-width and kept only for the first `o` columns, yielding the
    fused [out | x | 0] result with a single lane-dense full-block store.
    """
    x = x_ref[...]
    h = jnp.dot(x, w_ref[...], preferred_element_type=jnp.float32)
    bn = _bn_relu(h, g_ref[...], be_ref[...])
    col = jax.lax.broadcasted_iota(jnp.int32, h.shape, 1)
    out_ref[...] = jnp.where(col < o, bn, h).astype(out_ref.dtype)


# Constant augmentation blocks for the fallback path, built once per layer.
_FALLBACK_CONST_CACHE = {}


def _fallback_consts(i, o, padded):
    key = (i, o, padded)
    if key not in _FALLBACK_CONST_CACHE:
        extra = padded - o
        id_pad = jnp.concatenate(
            [jnp.eye(i, dtype=jnp.float32),
             jnp.zeros((i, padded - o - i), jnp.float32)], axis=1)  # (i, extra)
        _FALLBACK_CONST_CACHE[key] = (id_pad,
                                      jnp.ones((1, extra), jnp.float32),
                                      jnp.zeros((1, extra), jnp.float32))
    return _FALLBACK_CONST_CACHE[key]


def residual_forward(x, w, b, gamma, beta):
    """CTGAN Residual forward.

    x: (B, i) f32; w: (i, o) (== torch Linear weight.T); b/gamma/beta: (o,).
    Returns concat([relu(batchnorm(x @ w + b)), x], axis=1), shape (B, o+i).
    The Linear bias `b` is accepted for API parity but is mathematically
    inert under training-mode BN (mean subtraction cancels it), so it is
    not read by the kernels.
    """
    x = x.astype(jnp.float32)
    B, i = x.shape
    o = w.shape[1]
    total = o + i
    del b  # cancelled exactly by the batch-mean subtraction

    w = w.astype(jnp.float32)
    g2 = gamma.reshape(1, o).astype(jnp.float32)
    be2 = beta.reshape(1, o).astype(jnp.float32)

    cost = pl.CostEstimate(
        flops=2 * B * i * o + 8 * B * total,
        transcendentals=o,                               # rsqrt per feature
        bytes_accessed=4 * (B * i + i * o + 2 * o + B * total),
    )

    tile = _tile_width()
    if o % tile or i % tile:
        tile = _LANE                                     # 128-lane fallback tile

    if o % tile == 0 and i % tile == 0:
        # ---- Lane-aligned fast path (real CTGAN layers: 128/256/384). ----
        n_bn = o // tile
        n_copy = i // tile
        n_tiles = n_bn + n_copy
        order, wcol = _interleave_schedule(n_bn, n_copy)
        perm_arr = jnp.asarray(order, dtype=jnp.int32)
        wcol_arr = jnp.asarray(wcol, dtype=jnp.int32)

        lhs_map = lambda j, perm, wcol: (0, 0)           # resident matmul LHS
        col_map = lambda j, perm, wcol: (0, wcol[j])     # W / gamma / beta column
        out_map = lambda j, perm, wcol: (0, perm[j])     # interleaved output tile

        # Working-set estimate (double-buffered streams + temporaries); keep
        # within v7x's 64 MiB physical VMEM, above all default scoped limits.
        est = 4 * (2 * B * i + 2 * i * tile + 4 * tile + 6 * B * tile)
        vmem_limit = min(max(2 * est, 32 * 1024 * 1024), 64 * 1024 * 1024)

        kernel = functools.partial(_residual_kernel_tiled, n_bn_tiles=n_bn,
                                   n_copy_tiles=n_copy, tile_f=tile)
        return pl.pallas_call(
            kernel,
            out_shape=jax.ShapeDtypeStruct((B, total), jnp.float32),
            grid_spec=pltpu.PrefetchScalarGridSpec(
                num_scalar_prefetch=2,
                grid=(n_tiles,),
                in_specs=[
                    pl.BlockSpec((B, i), lhs_map),       # x: matmul LHS, resident
                    pl.BlockSpec((i, tile), col_map),    # W column tile
                    pl.BlockSpec((1, tile), col_map),    # gamma tile
                    pl.BlockSpec((1, tile), col_map),    # beta tile
                ],
                out_specs=pl.BlockSpec((B, tile), out_map),
            ),
            compiler_params=pltpu.CompilerParams(
                dimension_semantics=("parallel",),
                vmem_limit_bytes=vmem_limit),
            cost_estimate=cost,
        )(perm_arr, wcol_arr, x, w, g2, be2)

    # ---- General fallback (small / unaligned feature widths). ----
    # Concat folded into the Linear layer via an identity block in W; output
    # padded to a multiple of 128 lanes for a single unmasked store, padding
    # sliced off afterwards (padded gamma=1 / beta=0, never kept).
    padded = pl.cdiv(total, _LANE) * _LANE
    id_pad, ones_row, zeros_row = _fallback_consts(i, o, padded)
    w_aug = jnp.concatenate([w, id_pad], axis=1)          # (i, padded)
    g_aug = jnp.concatenate([g2, ones_row], axis=1)
    be_aug = jnp.concatenate([be2, zeros_row], axis=1)

    kernel = functools.partial(_residual_kernel_fused_single, o=o)
    out = pl.pallas_call(
        kernel,
        out_shape=jax.ShapeDtypeStruct((B, padded), jnp.float32),
        cost_estimate=cost,
    )(x, w_aug, g_aug, be_aug)
    return out[:, :total] if padded != total else out


def reference_forward(x, w, b, gamma, beta):
    """Pure-JAX reference mirroring the PyTorch forward (training-mode BN)."""
    h = jnp.dot(x, w, precision=jax.lax.Precision.HIGHEST) + b
    mean = jnp.mean(h, axis=0, keepdims=True)
    var = jnp.mean((h - mean) ** 2, axis=0, keepdims=True)
    h = (h - mean) / jnp.sqrt(var + BN_EPS) * gamma + beta
    h = jnp.maximum(h, 0.0)
    return jnp.concatenate([h, x], axis=1)


def _make_inputs(key, B, I, O):
    k_x, k_w, k_b, k_g, k_be = jax.random.split(key, 5)
    x = jax.random.normal(k_x, (B, I), dtype=jnp.float32)
    bound = 1.0 / (I ** 0.5)
    w = jax.random.uniform(k_w, (I, O), minval=-bound, maxval=bound,
                           dtype=jnp.float32)            # == torch weight.T
    b = jax.random.uniform(k_b, (O,), minval=-bound, maxval=bound,
                           dtype=jnp.float32)
    gamma = 1.0 + 0.1 * jax.random.normal(k_g, (O,), dtype=jnp.float32)
    beta = 0.1 * jax.random.normal(k_be, (O,), dtype=jnp.float32)
    return x, w, b, gamma, beta


def _check(out, ref, shape):
    assert out.shape == shape, (out.shape, shape)
    # Tolerance covers MXU f32 multi-pass rounding vs the HIGHEST-precision
    # XLA reference (plus the exact-in-math bias drop / one-pass variance).
    err = jnp.max(jnp.abs(out - ref))
    assert jnp.allclose(out, ref, atol=1e-2, rtol=1e-2), f"max err {err}"


if __name__ == "__main__":
    key = jax.random.PRNGKey(0)
    k1, k2, k3, k4 = jax.random.split(key, 4)

    # 1) Small / unaligned widths -> single-block fused fallback (padded).
    x, w, b, g, be = _make_inputs(k1, 8, 32, 32)
    out = jax.block_until_ready(residual_forward(x, w, b, g, be))
    _check(out, reference_forward(x, w, b, g, be), (8, 64))

    # 2) Lane-aligned widths -> interleaved tiled grid (128-lane tiles).
    x, w, b, g, be = _make_inputs(k2, 16, 128, 128)
    out = jax.block_until_ready(residual_forward(x, w, b, g, be))
    _check(out, reference_forward(x, w, b, g, be), (16, 256))

    # 3) 256-aligned widths -> 256-lane tiles on v6e/v7x (128 elsewhere).
    x, w, b, g, be = _make_inputs(k3, 32, 256, 256)
    out = jax.block_until_ready(residual_forward(x, w, b, g, be))
    _check(out, reference_forward(x, w, b, g, be), (32, 512))

    # 4) Realistic CTGAN second-layer shape (i != o, uneven tile counts).
    x, w, b, g, be = _make_inputs(k4, 16, 384, 256)
    out = jax.block_until_ready(residual_forward(x, w, b, g, be))
    _check(out, reference_forward(x, w, b, g, be), (16, 640))

    print("KERNEL_OK")
</pallas_src>

<mosaic_0001>
module attributes {stable_mosaic.version = 11 : i64} {
  func.func @_residual_kernel_fused_single(%arg0: memref<8x32xf32, #tpu.memory_space<vmem>>, %arg1: memref<32x128xf32, #tpu.memory_space<vmem>>, %arg2: memref<1x128xf32, #tpu.memory_space<vmem>>, %arg3: memref<1x128xf32, #tpu.memory_space<vmem>>, %arg4: memref<8x128xf32, #tpu.memory_space<vmem>>) attributes {dimension_semantics = [], scalar_prefetch = 0 : i64, scratch_operands = 0 : i64, tpu.core_type = #tpu.core_type<tc>} {
    %c0 = arith.constant 0 : index
    %c0_0 = arith.constant 0 : index
    %0 = vector.load %arg0[%c0, %c0_0] : memref<8x32xf32, #tpu.memory_space<vmem>>, vector<8x32xf32>
    %c0_1 = arith.constant 0 : index
    %c0_2 = arith.constant 0 : index
    %1 = vector.load %arg1[%c0_1, %c0_2] : memref<32x128xf32, #tpu.memory_space<vmem>>, vector<32x128xf32>
    %cst = arith.constant dense<0.000000e+00> : vector<8x128xf32>
    %2 = tpu.matmul %0, %1, %cst {dimension_numbers = #tpu.dot_dimension_numbers<[1], [0], [0], [1], [0, 0, 1, 1], [], []>} : vector<8x32xf32>, vector<32x128xf32>, vector<8x128xf32> -> vector<8x128xf32>
    %c0_3 = arith.constant 0 : index
    %c0_4 = arith.constant 0 : index
    %3 = vector.load %arg2[%c0_3, %c0_4] : memref<1x128xf32, #tpu.memory_space<vmem>>, vector<1x128xf32>
    %c0_5 = arith.constant 0 : index
    %c0_6 = arith.constant 0 : index
    %4 = vector.load %arg3[%c0_5, %c0_6] : memref<1x128xf32, #tpu.memory_space<vmem>>, vector<1x128xf32>
    %cst_7 = arith.constant dense<0.000000e+00> : vector<128xf32>
    %5 = vector.multi_reduction <add>, %2, %cst_7 [0] : vector<8x128xf32> to vector<128xf32>
    %6 = vector.shape_cast %5 : vector<128xf32> to vector<1x128xf32>
    %cst_8 = arith.constant 1.250000e-01 : f32
    %7 = vector.broadcast %cst_8 : f32 to vector<1x128xf32>
    %8 = arith.mulf %6, %7 : vector<1x128xf32>
    %9 = arith.mulf %2, %2 : vector<8x128xf32>
    %cst_9 = arith.constant dense<0.000000e+00> : vector<128xf32>
    %10 = vector.multi_reduction <add>, %9, %cst_9 [0] : vector<8x128xf32> to vector<128xf32>
    %11 = vector.shape_cast %10 : vector<128xf32> to vector<1x128xf32>
    %cst_10 = arith.constant 1.250000e-01 : f32
    %12 = vector.broadcast %cst_10 : f32 to vector<1x128xf32>
    %13 = arith.mulf %11, %12 : vector<1x128xf32>
    %14 = arith.mulf %8, %8 : vector<1x128xf32>
    %15 = arith.subf %13, %14 : vector<1x128xf32>
    %cst_11 = arith.constant 0.000000e+00 : f32
    %16 = vector.broadcast %cst_11 : f32 to vector<1x128xf32>
    %17 = arith.maximumf %15, %16 : vector<1x128xf32>
    %cst_12 = arith.constant 9.99999974E-6 : f32
    %18 = vector.broadcast %cst_12 : f32 to vector<1x128xf32>
    %19 = arith.addf %17, %18 : vector<1x128xf32>
    %20 = math.rsqrt %19 : vector<1x128xf32>
    %21 = arith.mulf %3, %20 : vector<1x128xf32>
    %22 = arith.mulf %8, %21 : vector<1x128xf32>
    %23 = arith.subf %4, %22 : vector<1x128xf32>
    %24 = vector.broadcast %21 : vector<1x128xf32> to vector<8x128xf32>
    %25 = arith.mulf %2, %24 : vector<8x128xf32>
    %26 = vector.broadcast %23 : vector<1x128xf32> to vector<8x128xf32>
    %27 = arith.addf %25, %26 : vector<8x128xf32>
    %cst_13 = arith.constant 0.000000e+00 : f32
    %28 = vector.broadcast %cst_13 : f32 to vector<8x128xf32>
    %29 = arith.maximumf %27, %28 : vector<8x128xf32>
    %30 = tpu.iota {dimensions = array<i32: 1>} : vector<8x128xi32>
    %c32_i32 = arith.constant 32 : i32
    %31 = vector.broadcast %c32_i32 : i32 to vector<8x128xi32>
    %32 = arith.cmpi slt, %30, %31 : vector<8x128xi32>
    %33 = arith.select %32, %29, %2 : vector<8x128xi1>, vector<8x128xf32>
    %c0_14 = arith.constant 0 : index
    %c0_15 = arith.constant 0 : index
    %34 = vector.load %arg4[%c0_14, %c0_15] : memref<8x128xf32, #tpu.memory_space<vmem>>, vector<8x128xf32>
    tpu.vector_store %arg4[%c0_14, %c0_15], %33 {strides = array<i32>} : memref<8x128xf32, #tpu.memory_space<vmem>>, vector<8x128xf32>,
    return
  }
}

</mosaic_0001>

<bundles_post_ra>
// kernel: tpu_custom_call.1
= control target key start
LH: loop header
LB: loop body
LE: loop exit
PB: predicated region body
PF: predicated region fallthrough
CT: control target
= control target key end

     0   :  { %9 = vsyncpa [#allocation3], 0  ;;  %s323_s0 = inlined_call_operand.hbm [shape: f32[8,32], index: 0, kind: input, shape index: {}]   ;;  %s324_s1 = inlined_call_operand.hbm [shape: f32[32,128], index: 1, kind: input, shape index: {}]   ;;  %s325_s2 = inlined_call_operand.vmem [shape: f32[1,128], index: 2, kind: input, shape index: {}]   ;;  %s326_s3 = inlined_call_operand.vmem [shape: f32[1,128], index: 3, kind: input, shape index: {}]   ;;  %s327_s4 = inlined_call_operand.hbm [shape: f32[8,128], index: 4, kind: output, shape index: {}]  }
   0x1   :  { %10 = vsyncpa [#allocation6], 0 }
   0x2   :  { %11 = vsyncpa [#allocation4], 0  ;;  %s276_s15 = smov [#allocation2]   ;;  %s277_s17 = smov [#allocation5]  }
   0x3   :  { %s18_s16 = sshll.u32 %s276_s15, 4  ;;  %s27_s18 = sshll.u32 %s277_s17, 4  ;;  %s19_s16 = int_to_ptr.vmem [resolvable:$true] %s18_s16  ;;  %s28_s18 = int_to_ptr.vmem [resolvable:$true] %s27_s18 }
   0x4   :  { %s218_s19 = scalar_lea.vmem %s19_s16, 128  ;;  %p223_p1 = scmp.lt.s32.totalorder %s19_s16, %s19_s16 }
   0x5   :  { %p219_p0 = scmp.ne.s32.totalorder %s19_s16, %s218_s19  ;;  %p224_p2 = scmp.lt.s32.totalorder %s218_s19, %s218_s19 }
   0x7   :  { %p225_p3 = por %p224_p2, %p223_p1 }
   0x9   :  { %p226_p4 = pnand %p225_p3, %p219_p0 }
   0xb   :  { %229 = shalt.err (!%p226_p4)
}
   0xc   :  { %21 = dma.hbm_to_vmem [thread:$0]  %s323_s0, 128, %s19_s16, [#allocation3]  }
   0xd   :  { %s238_s22 = scalar_lea.vmem %s28_s18, 512  ;;  %p243_p6 = scmp.lt.s32.totalorder %s28_s18, %s28_s18 }
   0xe   :  { %p239_p5 = scmp.ne.s32.totalorder %s28_s18, %s238_s22  ;;  %p244_p7 = scmp.lt.s32.totalorder %s238_s22, %s238_s22 }
  0x10   :  { %p245_p8 = por %p244_p7, %p243_p6 }
  0x12   :  { %p246_p9 = pnand %p245_p8, %p239_p5 }
  0x14   :  { %249 = shalt.err (!%p246_p9)
}
  0x15   :  { %s278_s23 = smov 128   ;;  %s279_s24 = smov 8  }
  0x16   :  { %33 = dma.hbm_to_vmem [thread:$0]  %s324_s1, 512, %s28_s18, [#allocation6], %s278_s23, %s278_s23, %s279_s24  }
  0x17   :  { %270 = dma.done.wait [#allocation3], 128  }
  0x18   :  { %271 = vsyncadd [#allocation3], 4294967168 }
  0x19   :  { %272 = dma.done.wait [#allocation6], 512  }
  0x1a   :  { %273 = vsyncadd [#allocation6], 4294966784  ;;  %v280_v0 = vmov 0.0   ;;  %vm281_vm0 = vmmov 0   ;;  %v48_v1 = vld [vmem:[#allocation5 + $0x18] sm:$0xff]  ;;  %v47_v2 = vld [vmem:[#allocation5 + $0x10] sm:$0xff]  ;;  %v149_v27 = vlaneseq }
  0x1b   :  { %190 = vmatprep.subr.mxu0 %v280_v0  ;;  %198 = vmatprep.mubr.msk.f32.mxu0 %vm281_vm0, %v280_v0  ;;  %v46_v3 = vld [vmem:[#allocation5 + $0x8] sm:$0xff]  ;;  %v45_v4 = vld [vmem:[#allocation5] sm:$0xff]  ;;  %v44_v5 = vld [vmem:[#allocation2] sm:$0xff]  ;;  %vm49_vm1 = vcmask 261120   ;;  %s282_s29 = smov [#allocation7]  }
  0x1c   :  { %191 = vmatpush3.msra.mxu0 %v48_v1  ;;  %v150_v28 = vshrl.u32 %v149_v27, 7  ;;  %v123_v29 = vld [vmem:[%s325_s2] sm:$0x1]  ;;  %v164_v37 = vand.u32 127, %v149_v27  ;;  %s174_s30 = sshll.u32 %s282_s29, 4  ;;  %s175_s30 = int_to_ptr.vmem [resolvable:$true] %s174_s30 }
  0x1d   :  { %192 = vmatprep.subr.mxu0 %v280_v0  ;;  %v124_v33 = vld [vmem:[%s326_s3] sm:$0x1]  ;;  %s250_s2 = scalar_lea.vmem %s175_s30, 128  ;;  %p255_p11 = scmp.lt.s32.totalorder %s175_s30, %s175_s30 }
  0x1e   :  { %193 = vmatpush3.msra.mxu0 %v47_v2  ;;  %v151_v30 = vsub.s32 0, %v150_v28  ;;  %vm165_vm2 = vcmp.lt.s32.totalorder %v164_v37, 32  ;;  %p251_p10 = scmp.ne.s32.totalorder %s175_s30, %s250_s2  ;;  %p256_p12 = scmp.lt.s32.totalorder %s250_s2, %s250_s2 }
  0x1f   :  { %194 = vmatprep.subr.mxu0 %v280_v0 }
  0x20   :  { %195 = vmatpush3.msra.mxu0 %v46_v3  ;;  %p257_p13 = por %p256_p12, %p255_p11 }
  0x21   :  { %196 = vmatprep.subr.mxu0 %v280_v0 }
  0x22   :  { %197 = vmatpush3.msra.mxu0 %v45_v4  ;;  %p258_p0 = pnand %p257_p13, %p251_p10 }
  0x23   :  { %199 = vmatmul.mubr.msk.f32.vlgmr.msra.gmra.mxu0 %vm49_vm1, %v44_v5 }
  0xe3   :  { %v119_v6 = vpop.f32.mrf.mxu0 }
  0xe4   :  { %v125_v7 = vrot.slane %v119_v6, 4  ;;  %v132_v8 = vmul.f32 %v119_v6, %v119_v6 }
  0xe5   :  { %v200_v9 = vpop.f32.mrf.mxu0 }
  0xe6   :  { %v126_v10 = vadd.f32 %v125_v7, %v119_v6  ;;  %v133_v11 = vrot.slane %v132_v8, 4 }
  0xe8   :  { %v127_v12 = vrot.slane %v126_v10, 2  ;;  %v134_v13 = vadd.f32 %v133_v11, %v132_v8 }
  0xea   :  { %v128_v14 = vadd.f32 %v127_v12, %v126_v10  ;;  %v135_v15 = vrot.slane %v134_v13, 2 }
  0xec   :  { %v129_v16 = vrot.slane %v128_v14, 1  ;;  %v136_v17 = vadd.f32 %v135_v15, %v134_v13 }
  0xee   :  { %v130_v18 = vadd.f32 %v129_v16, %v128_v14  ;;  %v137_v19 = vrot.slane %v136_v17, 1 }
  0xf0   :  { %v131_v20 = vmul.f32 0.125, %v130_v18  ;;  %v138_v21 = vadd.f32 %v137_v19, %v136_v17 }
  0xf2   :  { %v139_v22 = vmul.f32 0.125, %v138_v21  ;;  %v140_v23 = vmul.f32 %v131_v20, %v131_v20 }
  0xf4   :  { %v141_v24 = vsub.f32 %v139_v22, %v140_v23 }
  0xf6   :  { %v142_v25 = vmax.f32 %v141_v24, 0.0 }
  0xf8   :  { %v143_v26 = vadd.f32 1e-05, %v142_v25 }
  0xfa   :  { %208 = vrsqrt.f32 %v143_v26 }
 0x107   :  { %v209_v31 = vpop.eup %208 }
 0x108   :  { %v145_v32 = vmul.f32 %v209_v31, %v123_v29 }
 0x10a   :  { %v146_v34 = vmul.f32 %v145_v32, %v131_v20  ;;  %v152_v35 = vrot.slane %v145_v32, %v151_v30 }
 0x10c   :  { %v147_v36 = vsub.f32 %v124_v33, %v146_v34  ;;  %v154_v38 = vmul.f32 %v152_v35, %v119_v6 }
 0x10e   :  { %v159_v39 = vrot.slane %v147_v36, %v151_v30 }
 0x110   :  { %v161_v40 = vadd.f32 %v159_v39, %v154_v38 }
 0x112   :  { %v162_v41 = vmax.f32 %v161_v40, 0.0 }
 0x114   :  { %v166_v42 = vsel %vm165_vm2, %v162_v41, %v119_v6 }
 0x115   :  { %167 = vst [vmem:[#allocation7] sm:$0xff] %v166_v42 }
 0x116   :  { %261 = shalt.err (!%p258_p0)
}
 0x117   :  { %177 = dma.vmem_to_hbm [thread:$0]  %s175_s30, 128, %s327_s4, [#allocation4]  }
 0x118   :  { %274 = dma.done.wait [#allocation4], 128  }
 0x119   :  { %275 = vsyncadd [#allocation4], 4294967168 }
 0x11a   :  { %181 = vsyncpa [#allocation3], 1 }
 0x11b   :  { %182 = vsyncpa [#allocation6], 1 }
 0x11c   :  { %183 = vsyncpa [#allocation4], 1 }

</bundles_post_ra>
